<compile_context>
chip_gen: v7x
topology: tpu7x:2x2x1
jax: 0.10.0
libtpu: 0.0.40
codegen_flags: <defaults>
</compile_context>

<pallas_src>
import functools

import jax
import jax.numpy as jnp
from jax.experimental import pallas as pl
from jax.experimental.pallas import tpu as pltpu


def _round_up(x, m):
    return (x + m - 1) // m * m


def _pick_row_tile(np_):
    # np_ is a multiple of 128, so this always returns a valid divisor.
    for tr in (512, 256, 128):
        if np_ % tr == 0:
            return tr
    return 128


# ----------------------------- Pallas kernel --------------------------------

def _multigcn_kernel(x_ref, a_ref, w_ref, b_ref, wlin_ref, blin_ref,
                     h_out_ref, y_ref, xw_ref, hcur_ref,
                     *, n_layers, cat, tr):
    """Grid = (layer l, row-tile i); i is the fast axis.

    x_ref    : [Np, Cp]      bf16  node features (VMEM-resident across grid)
    a_ref    : [tr, Np]      bf16  row tile of the normalized adjacency
    w_ref    : [1, Cp, Cp]   bf16  GCN weight of layer l
    b_ref    : [1, 1, Cp]    f32   GCN bias of layer l
    wlin_ref : [S, Cp, Kp]   bf16  per-segment head weights (S = L+1 if cat else 1)
    blin_ref : [1, Kp]       f32   head bias
    h_out    : [1, tr, Cp]   bf16  (out) per-layer activation row tile
    y_ref    : [Np, Kp]      f32   (out) head logits, VMEM-resident accumulator
    xw_ref   : [Np, Cp]      bf16  scratch: h_l @ W_l (refreshed at i == 0)
    hcur_ref : [Np, Cp]      bf16  scratch: current-layer activation h_{l+1}
    """
    l = pl.program_id(0)
    i = pl.program_id(1)
    row0 = pl.multiple_of(i * tr, tr)

    w_l = w_ref[0]                                 # [Cp, Cp] bf16

    # Once per layer: feature transform of the FULL previous activation.
    @pl.when((i == 0) & (l == 0))
    def _():
        xw_ref[...] = jnp.dot(
            x_ref[...], w_l, preferred_element_type=jnp.float32
        ).astype(jnp.bfloat16)

    @pl.when((i == 0) & (l > 0))
    def _():
        xw_ref[...] = jnp.dot(
            hcur_ref[...], w_l, preferred_element_type=jnp.float32
        ).astype(jnp.bfloat16)

    # Aggregate one row tile:  h_{l+1}[rows] = A[rows, :] @ (h_l @ W_l) + b_l
    h_tile = (
        jnp.dot(a_ref[...], xw_ref[...], preferred_element_type=jnp.float32)
        + b_ref[0]
    )

    hcur_ref[pl.ds(row0, tr), :] = h_tile.astype(jnp.bfloat16)
    h_out_ref[0] = h_tile.astype(jnp.bfloat16)

    # Segmented head, accumulated straight into the resident y output.
    if cat:
        contrib = jnp.dot(h_tile.astype(jnp.bfloat16), wlin_ref[l + 1],
                          preferred_element_type=jnp.float32)

        @pl.when(l == 0)
        def _():
            x_tile = x_ref[pl.ds(row0, tr), :]
            y_ref[pl.ds(row0, tr), :] = (
                blin_ref[...]
                + jnp.dot(x_tile, wlin_ref[0],
                          preferred_element_type=jnp.float32)
                + contrib
            )

        @pl.when(l > 0)
        def _():
            y_ref[pl.ds(row0, tr), :] = y_ref[pl.ds(row0, tr), :] + contrib
    else:
        @pl.when(l == n_layers - 1)
        def _():
            y_ref[pl.ds(row0, tr), :] = blin_ref[...] + jnp.dot(
                h_tile.astype(jnp.bfloat16), wlin_ref[0],
                preferred_element_type=jnp.float32)


# ------------------------------ fused wrapper --------------------------------

def multigcn_fused(params, x, a_hat, n_classes, cat):
    """Pad / pack operands (bf16), run the fused kernel, un-pad the results."""
    n, in_ch = x.shape
    n_layers = len(params["gcn"])
    out_ch = params["gcn"][0][0].shape[1]

    cp = _round_up(max(in_ch, out_ch), 128)       # padded feature width
    np_ = _round_up(n, 128)                       # padded node count
    kp = _round_up(n_classes, 128)                # padded class count
    tr = _pick_row_tile(np_)                      # adjacency row tile
    n_row_tiles = np_ // tr

    bf16, f32 = jnp.bfloat16, jnp.float32

    # Features / adjacency: built directly in bf16 (no padded f32 intermediate).
    x_p = jnp.zeros((np_, cp), bf16).at[:n, :in_ch].set(x.astype(bf16))
    a_p = jnp.zeros((np_, np_), bf16).at[:n, :n].set(a_hat.astype(bf16))

    # GCN layer weights / biases (weights bf16, biases f32).
    w_stack, b_stack = [], []
    for (w, b) in params["gcn"]:
        ci, co = w.shape
        w_stack.append(jnp.zeros((cp, cp), bf16).at[:ci, :co].set(w.astype(bf16)))
        b_stack.append(jnp.zeros((1, cp), f32).at[0, :co].set(b))
    w_stack = jnp.stack(w_stack)                  # [L, Cp, Cp] bf16
    b_stack = jnp.stack(b_stack)                  # [L, 1, Cp]  f32

    # Split the Linear head by concat segments (makes the concat free).
    lin_w = params["lin_w"]                       # [n_classes, lin_in]
    seg_sizes = [in_ch] + [out_ch] * n_layers if cat else [out_ch]
    wlin_segs, off = [], 0
    for s in seg_sizes:
        wseg = lin_w[:, off:off + s].T            # [s, n_classes]
        wlin_segs.append(
            jnp.zeros((cp, kp), bf16).at[:s, :n_classes].set(wseg.astype(bf16)))
        off += s
    wlin = jnp.stack(wlin_segs)                   # [S, Cp, Kp] bf16
    blin = jnp.zeros((1, kp), f32).at[0, :n_classes].set(params["lin_b"])
    n_segs = len(seg_sizes)

    # Advisory cost estimate for XLA scheduling of the surrounding glue.
    flops = (2 * n_layers * (np_ * np_ * cp + np_ * cp * cp)
             + 2 * n_segs * np_ * cp * kp)
    bytes_accessed = (n_layers * np_ * np_ * 2            # A streamed per layer
                      + np_ * cp * 2                      # x
                      + n_layers * (cp * cp * 2 + cp * 4)  # W, b
                      + n_segs * cp * kp * 2 + kp * 4      # Wlin, blin
                      + n_layers * np_ * cp * 2            # h writeback (bf16)
                      + np_ * kp * 4)                      # y

    # Scoped-VMEM budget from the actual buffer sum (+ slack), capped at 64 MiB
    # so the same setting is valid on v5e/v6e (128 MiB) and v7x (64 MiB).
    needed_vmem = (2 * tr * np_ * 2        # A row tile, double-buffered, bf16
                   + np_ * cp * 2          # x resident bf16
                   + 2 * cp * cp * 2       # W block (double-buffered) bf16
                   + 2 * cp * 4            # bias block
                   + n_segs * cp * kp * 2  # Wlin resident bf16
                   + kp * 4                # blin
                   + np_ * kp * 4          # y resident accumulator f32
                   + 2 * tr * cp * 2       # h_out block (double-buffered) bf16
                   + 2 * np_ * cp * 2)     # xw + hcur scratch bf16
    vmem_limit = int(min(max(needed_vmem + (4 << 20), 32 << 20), 64 << 20))

    kernel = functools.partial(_multigcn_kernel,
                               n_layers=n_layers, cat=cat, tr=tr)

    h_layers, y_pad = pl.pallas_call(
        kernel,
        out_shape=(
            jax.ShapeDtypeStruct((n_layers, np_, cp), bf16),
            jax.ShapeDtypeStruct((np_, kp), f32),
        ),
        grid=(n_layers, n_row_tiles),
        in_specs=[
            pl.BlockSpec((np_, cp), lambda l, i: (0, 0)),        # x (resident)
            pl.BlockSpec((tr, np_), lambda l, i: (i, 0)),        # A row tile
            pl.BlockSpec((1, cp, cp), lambda l, i: (l, 0, 0)),   # W_l
            pl.BlockSpec((1, 1, cp), lambda l, i: (l, 0, 0)),    # b_l
            pl.BlockSpec((n_segs, cp, kp), lambda l, i: (0, 0, 0)),  # Wlin
            pl.BlockSpec((1, kp), lambda l, i: (0, 0)),          # blin
        ],
        out_specs=(
            pl.BlockSpec((1, tr, cp), lambda l, i: (l, i, 0)),   # h per layer
            pl.BlockSpec((np_, kp), lambda l, i: (0, 0)),        # y (resident)
        ),
        scratch_shapes=[
            pltpu.VMEM((np_, cp), bf16),   # xw = h_l @ W_l
            pltpu.VMEM((np_, cp), bf16),   # h_{l+1} carried to the next layer
        ],
        compiler_params=pltpu.CompilerParams(
            dimension_semantics=("arbitrary", "arbitrary"),
            vmem_limit_bytes=vmem_limit),
        cost_estimate=pl.CostEstimate(
            flops=flops, transcendentals=0, bytes_accessed=bytes_accessed),
    )(x_p, a_p, w_stack, b_stack, wlin, blin)

    # Un-pad and rebuild the concatenated representation (cheap slices).
    if cat:
        segs = [x] + [h_layers[l, :n, :out_ch].astype(f32)
                      for l in range(n_layers)]
        h_out = jnp.concatenate(segs, axis=-1)
    else:
        h_out = h_layers[n_layers - 1, :n, :out_ch].astype(f32)
    y_out = y_pad[:n, :n_classes]
    return y_out, h_out


# ------------------------------ graph glue -----------------------------------

def normalized_adjacency(edge_index, num_nodes):
    """Dense A_hat = D^-1/2 (A + I) D^-1/2 from edge_index [2, E] (src, dst)."""
    src, dst = edge_index[0], edge_index[1]
    a = jnp.zeros((num_nodes, num_nodes), jnp.float32)
    a = a.at[dst, src].add(1.0)                    # message flows src -> dst
    a = a + jnp.eye(num_nodes, dtype=jnp.float32)  # self loops
    deg = jnp.sum(a, axis=1)
    dinv = jnp.where(deg > 0, 1.0 / jnp.sqrt(deg), 0.0)
    return dinv[:, None] * a * dinv[None, :]


# ------------------------------ MULTIGCN -------------------------------------

def init_multigcn_params(key, in_channels, out_channels, n_classes,
                         n_layers=3, cat=True):
    params = {"gcn": []}
    c_in = in_channels
    for _ in range(n_layers):
        key, kw = jax.random.split(key)
        scale = jnp.sqrt(6.0 / (c_in + out_channels))  # glorot-uniform
        w = jax.random.uniform(kw, (c_in, out_channels), jnp.float32,
                               minval=-scale, maxval=scale)
        b = jnp.zeros((out_channels,), jnp.float32)
        params["gcn"].append((w, b))
        c_in = out_channels
    lin_in = in_channels + out_channels * n_layers if cat else out_channels
    key, kw, kb = jax.random.split(key, 3)
    bound = 1.0 / jnp.sqrt(lin_in)
    params["lin_w"] = jax.random.uniform(kw, (n_classes, lin_in), jnp.float32,
                                         minval=-bound, maxval=bound)
    params["lin_b"] = jax.random.uniform(kb, (n_classes,), jnp.float32,
                                         minval=-bound, maxval=bound)
    return params


@functools.partial(jax.jit, static_argnames=("n_classes", "cat"))
def multigcn_forward(params, x, a_hat, n_classes, x_masked=None,
                     a_hat_masked=None, cat=True):
    # Note: no nonlinearity between layers — matches the reference nn.Module.
    y_unmasked, h_unmasked = multigcn_fused(params, x, a_hat, n_classes, cat)
    if x_masked is not None and a_hat_masked is not None:
        predicted, _ = multigcn_fused(params, x_masked, a_hat_masked,
                                      n_classes, cat)
        return predicted, h_unmasked
    return y_unmasked, h_unmasked


# ------------------------- pure-JAX reference (check) ------------------------

def multigcn_reference(params, x, a_hat, cat):
    xs = [x]
    for (w, b) in params["gcn"]:
        xs.append(a_hat @ (xs[-1] @ w) + b[None, :])
    h = jnp.concatenate(xs, axis=-1) if cat else xs[-1]
    y = h @ params["lin_w"].T + params["lin_b"][None, :]
    return y, h


# --------------------------------- main --------------------------------------

if __name__ == "__main__":
    N = 16            # nodes
    IN_CH = 4
    OUT_CH = 8
    N_CLASSES = 3
    N_LAYERS = 3
    CAT = True

    key = jax.random.PRNGKey(0)
    key, kx = jax.random.split(key)
    x = jax.random.normal(kx, (N, IN_CH), jnp.float32)

    # deterministic ring graph, both directions
    src = jnp.arange(N, dtype=jnp.int32)
    dst = (src + 1) % N
    edge_index = jnp.stack(
        [jnp.concatenate([src, dst]), jnp.concatenate([dst, src])], axis=0
    )
    a_hat = normalized_adjacency(edge_index, N)

    params = init_multigcn_params(key, IN_CH, OUT_CH, N_CLASSES,
                                  n_layers=N_LAYERS, cat=CAT)

    predicted, h_unmasked = multigcn_forward(params, x, a_hat,
                                             n_classes=N_CLASSES, cat=CAT)
    jax.block_until_ready((predicted, h_unmasked))

    assert predicted.shape == (N, N_CLASSES)
    assert h_unmasked.shape == (N, IN_CH + OUT_CH * N_LAYERS)

    # Numerical check vs pure-JAX f32 reference (kernel uses bf16 operands
    # with f32 accumulation, so a loose-ish tolerance is expected).
    y_ref, h_ref = multigcn_reference(params, x, a_hat, CAT)
    assert jnp.allclose(predicted, y_ref, atol=1e-1, rtol=1e-1)
    assert jnp.allclose(h_unmasked, h_ref, atol=1e-1, rtol=1e-1)

    print("KERNEL_OK")
</pallas_src>

<mosaic_0001>
module attributes {stable_mosaic.version = 11 : i64} {
  func.func @_multigcn_kernel(%arg0: i32, %arg1: i32, %arg2: memref<128x128xbf16, #tpu.memory_space<vmem>>, %arg3: memref<128x128xbf16, #tpu.memory_space<vmem>>, %arg4: memref<1x128x128xbf16, #tpu.memory_space<vmem>>, %arg5: memref<1x1x128xf32, #tpu.memory_space<vmem>>, %arg6: memref<4x128x128xbf16, #tpu.memory_space<vmem>>, %arg7: memref<1x128xf32, #tpu.memory_space<vmem>>, %arg8: memref<1x128x128xbf16, #tpu.memory_space<vmem>>, %arg9: memref<128x128xf32, #tpu.memory_space<vmem>>, %arg10: memref<128x128xbf16, #tpu.memory_space<vmem>>, %arg11: memref<128x128xbf16, #tpu.memory_space<vmem>>) attributes {dimension_semantics = [#tpu.dimension_semantics<arbitrary>, #tpu.dimension_semantics<arbitrary>], iteration_bounds = array<i64: 3, 1>, scalar_prefetch = 0 : i64, scratch_operands = 2 : i64, tpu.core_type = #tpu.core_type<tc>, window_params = [{pipeline_mode = #tpu.pipeline_mode<synchronous>, transform_indices = @transform_0, window_bounds = array<i64: 128, 128>}, {transform_indices = @transform_1, window_bounds = array<i64: 128, 128>}, {transform_indices = @transform_2, window_bounds = array<i64: 1, 128, 128>}, {transform_indices = @transform_3, window_bounds = array<i64: 1, 1, 128>}, {pipeline_mode = #tpu.pipeline_mode<synchronous>, transform_indices = @transform_4, window_bounds = array<i64: 4, 128, 128>}, {pipeline_mode = #tpu.pipeline_mode<synchronous>, transform_indices = @transform_5, window_bounds = array<i64: 1, 128>}, {transform_indices = @transform_6, window_bounds = array<i64: 1, 128, 128>}, {pipeline_mode = #tpu.pipeline_mode<synchronous>, transform_indices = @transform_7, window_bounds = array<i64: 128, 128>}]} {
    %c128_i32 = arith.constant 128 : i32
    %0 = arith.muli %arg1, %c128_i32 : i32
    %1 = tpu.assume_multiple %0, 128 : i32
    %c0 = arith.constant 0 : index
    %c0_0 = arith.constant 0 : index
    %c0_1 = arith.constant 0 : index
    %2 = vector.load %arg4[%c0, %c0_0, %c0_1] : memref<1x128x128xbf16, #tpu.memory_space<vmem>>, vector<1x128x128xbf16>
    %3 = vector.shape_cast %2 : vector<1x128x128xbf16> to vector<128x128xbf16>
    %c0_i32 = arith.constant 0 : i32
    %4 = arith.cmpi eq, %arg1, %c0_i32 : i32
    %c0_i32_2 = arith.constant 0 : i32
    %5 = arith.cmpi eq, %arg0, %c0_i32_2 : i32
    %6 = arith.andi %4, %5 : i1
    %7 = arith.extui %6 : i1 to i32
    %c0_i32_3 = arith.constant 0 : i32
    %8 = arith.cmpi ne, %7, %c0_i32_3 : i32
    scf.if %8 {
      %c0_25 = arith.constant 0 : index
      %c0_26 = arith.constant 0 : index
      %40 = vector.load %arg2[%c0_25, %c0_26] : memref<128x128xbf16, #tpu.memory_space<vmem>>, vector<128x128xbf16>
      %cst_27 = arith.constant dense<0.000000e+00> : vector<128x128xf32>
      %41 = tpu.matmul %40, %3, %cst_27 {dimension_numbers = #tpu.dot_dimension_numbers<[1], [0], [0], [1], [0, 0, 1, 1], [], []>} : vector<128x128xbf16>, vector<128x128xbf16>, vector<128x128xf32> -> vector<128x128xf32>
      %42 = arith.truncf %41 : vector<128x128xf32> to vector<128x128xbf16>
      %c0_28 = arith.constant 0 : index
      %c0_29 = arith.constant 0 : index
      %43 = vector.load %arg10[%c0_28, %c0_29] : memref<128x128xbf16, #tpu.memory_space<vmem>>, vector<128x128xbf16>
      tpu.vector_store %arg10[%c0_28, %c0_29], %42 {strides = array<i32>} : memref<128x128xbf16, #tpu.memory_space<vmem>>, vector<128x128xbf16>,
    } else {
    }
    %c0_i32_4 = arith.constant 0 : i32
    %9 = arith.cmpi eq, %arg1, %c0_i32_4 : i32
    %c0_i32_5 = arith.constant 0 : i32
    %10 = arith.cmpi sgt, %arg0, %c0_i32_5 : i32
    %11 = arith.andi %9, %10 : i1
    %12 = arith.extui %11 : i1 to i32
    %c0_i32_6 = arith.constant 0 : i32
    %13 = arith.cmpi ne, %12, %c0_i32_6 : i32
    scf.if %13 {
      %c0_25 = arith.constant 0 : index
      %c0_26 = arith.constant 0 : index
      %40 = vector.load %arg11[%c0_25, %c0_26] : memref<128x128xbf16, #tpu.memory_space<vmem>>, vector<128x128xbf16>
      %cst_27 = arith.constant dense<0.000000e+00> : vector<128x128xf32>
      %41 = tpu.matmul %40, %3, %cst_27 {dimension_numbers = #tpu.dot_dimension_numbers<[1], [0], [0], [1], [0, 0, 1, 1], [], []>} : vector<128x128xbf16>, vector<128x128xbf16>, vector<128x128xf32> -> vector<128x128xf32>
      %42 = arith.truncf %41 : vector<128x128xf32> to vector<128x128xbf16>
      %c0_28 = arith.constant 0 : index
      %c0_29 = arith.constant 0 : index
      %43 = vector.load %arg10[%c0_28, %c0_29] : memref<128x128xbf16, #tpu.memory_space<vmem>>, vector<128x128xbf16>
      tpu.vector_store %arg10[%c0_28, %c0_29], %42 {strides = array<i32>} : memref<128x128xbf16, #tpu.memory_space<vmem>>, vector<128x128xbf16>,
    } else {
    }
    %c0_7 = arith.constant 0 : index
    %c0_8 = arith.constant 0 : index
    %14 = vector.load %arg3[%c0_7, %c0_8] : memref<128x128xbf16, #tpu.memory_space<vmem>>, vector<128x128xbf16>
    %c0_9 = arith.constant 0 : index
    %c0_10 = arith.constant 0 : index
    %15 = vector.load %arg10[%c0_9, %c0_10] : memref<128x128xbf16, #tpu.memory_space<vmem>>, vector<128x128xbf16>
    %cst = arith.constant dense<0.000000e+00> : vector<128x128xf32>
    %16 = tpu.matmul %14, %15, %cst {dimension_numbers = #tpu.dot_dimension_numbers<[1], [0], [0], [1], [0, 0, 1, 1], [], []>} : vector<128x128xbf16>, vector<128x128xbf16>, vector<128x128xf32> -> vector<128x128xf32>
    %c0_11 = arith.constant 0 : index
    %c0_12 = arith.constant 0 : index
    %c0_13 = arith.constant 0 : index
    %17 = vector.load %arg5[%c0_11, %c0_12, %c0_13] : memref<1x1x128xf32, #tpu.memory_space<vmem>>, vector<1x1x128xf32>
    %18 = vector.shape_cast %17 : vector<1x1x128xf32> to vector<1x128xf32>
    %19 = vector.broadcast %18 : vector<1x128xf32> to vector<128x128xf32>
    %20 = arith.addf %16, %19 : vector<128x128xf32>
    %21 = arith.truncf %20 : vector<128x128xf32> to vector<128x128xbf16>
    %22 = arith.index_cast %1 : i32 to index
    %c0_14 = arith.constant 0 : index
    %23 = vector.load %arg11[%22, %c0_14] : memref<128x128xbf16, #tpu.memory_space<vmem>>, vector<128x128xbf16>
    tpu.vector_store %arg11[%22, %c0_14], %21 {strides = array<i32>} : memref<128x128xbf16, #tpu.memory_space<vmem>>, vector<128x128xbf16>,
    %24 = arith.truncf %20 : vector<128x128xf32> to vector<128x128xbf16>
    %c0_15 = arith.constant 0 : index
    %c0_16 = arith.constant 0 : index
    %c0_17 = arith.constant 0 : index
    %25 = vector.load %arg8[%c0_15, %c0_16, %c0_17] : memref<1x128x128xbf16, #tpu.memory_space<vmem>>, vector<1x128x128xbf16>
    %26 = vector.shape_cast %25 : vector<1x128x128xbf16> to vector<128x128xbf16>
    %27 = vector.shape_cast %24 : vector<128x128xbf16> to vector<1x128x128xbf16>
    tpu.vector_store %arg8[%c0_15, %c0_16, %c0_17], %27 {strides = array<i32>} : memref<1x128x128xbf16, #tpu.memory_space<vmem>>, vector<1x128x128xbf16>,
    %28 = arith.truncf %20 : vector<128x128xf32> to vector<128x128xbf16>
    %c1_i32 = arith.constant 1 : i32
    %29 = arith.addi %arg0, %c1_i32 : i32
    %30 = arith.index_cast %29 : i32 to index
    %c0_18 = arith.constant 0 : index
    %c0_19 = arith.constant 0 : index
    %31 = vector.load %arg6[%30, %c0_18, %c0_19] : memref<4x128x128xbf16, #tpu.memory_space<vmem>>, vector<1x128x128xbf16>
    %32 = vector.shape_cast %31 : vector<1x128x128xbf16> to vector<128x128xbf16>
    %cst_20 = arith.constant dense<0.000000e+00> : vector<128x128xf32>
    %33 = tpu.matmul %28, %32, %cst_20 {dimension_numbers = #tpu.dot_dimension_numbers<[1], [0], [0], [1], [0, 0, 1, 1], [], []>} : vector<128x128xbf16>, vector<128x128xbf16>, vector<128x128xf32> -> vector<128x128xf32>
    %c0_i32_21 = arith.constant 0 : i32
    %34 = arith.cmpi eq, %arg0, %c0_i32_21 : i32
    %35 = arith.extui %34 : i1 to i32
    %c0_i32_22 = arith.constant 0 : i32
    %36 = arith.cmpi ne, %35, %c0_i32_22 : i32
    scf.if %36 {
      %40 = arith.index_cast %1 : i32 to index
      %c0_25 = arith.constant 0 : index
      %41 = vector.load %arg2[%40, %c0_25] : memref<128x128xbf16, #tpu.memory_space<vmem>>, vector<128x128xbf16>
      %c0_26 = arith.constant 0 : index
      %c0_27 = arith.constant 0 : index
      %42 = vector.load %arg7[%c0_26, %c0_27] : memref<1x128xf32, #tpu.memory_space<vmem>>, vector<1x128xf32>
      %c0_28 = arith.constant 0 : index
      %c0_29 = arith.constant 0 : index
      %c0_30 = arith.constant 0 : index
      %43 = vector.load %arg6[%c0_28, %c0_29, %c0_30] : memref<4x128x128xbf16, #tpu.memory_space<vmem>>, vector<1x128x128xbf16>
      %44 = vector.shape_cast %43 : vector<1x128x128xbf16> to vector<128x128xbf16>
      %cst_31 = arith.constant dense<0.000000e+00> : vector<128x128xf32>
      %45 = tpu.matmul %41, %44, %cst_31 {dimension_numbers = #tpu.dot_dimension_numbers<[1], [0], [0], [1], [0, 0, 1, 1], [], []>} : vector<128x128xbf16>, vector<128x128xbf16>, vector<128x128xf32> -> vector<128x128xf32>
      %46 = vector.broadcast %42 : vector<1x128xf32> to vector<128x128xf32>
      %47 = arith.addf %46, %45 : vector<128x128xf32>
      %48 = arith.addf %47, %33 : vector<128x128xf32>
      %49 = arith.index_cast %1 : i32 to index
      %c0_32 = arith.constant 0 : index
      %50 = vector.load %arg9[%49, %c0_32] : memref<128x128xf32, #tpu.memory_space<vmem>>, vector<128x128xf32>
      tpu.vector_store %arg9[%49, %c0_32], %48 {strides = array<i32>} : memref<128x128xf32, #tpu.memory_space<vmem>>, vector<128x128xf32>,
    } else {
    }
    %c0_i32_23 = arith.constant 0 : i32
    %37 = arith.cmpi sgt, %arg0, %c0_i32_23 : i32
    %38 = arith.extui %37 : i1 to i32
    %c0_i32_24 = arith.constant 0 : i32
    %39 = arith.cmpi ne, %38, %c0_i32_24 : i32
    scf.if %39 {
      %40 = arith.index_cast %1 : i32 to index
      %c0_25 = arith.constant 0 : index
      %41 = vector.load %arg9[%40, %c0_25] : memref<128x128xf32, #tpu.memory_space<vmem>>, vector<128x128xf32>
      %42 = arith.addf %41, %33 : vector<128x128xf32>
      %43 = arith.index_cast %1 : i32 to index
      %c0_26 = arith.constant 0 : index
      %44 = vector.load %arg9[%43, %c0_26] : memref<128x128xf32, #tpu.memory_space<vmem>>, vector<128x128xf32>
      tpu.vector_store %arg9[%43, %c0_26], %42 {strides = array<i32>} : memref<128x128xf32, #tpu.memory_space<vmem>>, vector<128x128xf32>,
    } else {
    }
    return
  }
  func.func @transform_0(%arg0: i32, %arg1: i32) -> (i32, i32) {
    %c0_i32 = arith.constant 0 : i32
    %c0_i32_0 = arith.constant 0 : i32
    %c0_i32_1 = arith.constant 0 : i32
    return %c0_i32, %c0_i32_0 : i32, i32
  }
  func.func @transform_1(%arg0: i32, %arg1: i32) -> (i32, i32) {
    %c0_i32 = arith.constant 0 : i32
    %c0_i32_0 = arith.constant 0 : i32
    return %arg1, %c0_i32 : i32, i32
  }
  func.func @transform_2(%arg0: i32, %arg1: i32) -> (i32, i32, i32) {
    %c0_i32 = arith.constant 0 : i32
    %c0_i32_0 = arith.constant 0 : i32
    %c0_i32_1 = arith.constant 0 : i32
    return %arg0, %c0_i32, %c0_i32_0 : i32, i32, i32
  }
  func.func @transform_3(%arg0: i32, %arg1: i32) -> (i32, i32, i32) {
    %c0_i32 = arith.constant 0 : i32
    %c0_i32_0 = arith.constant 0 : i32
    %c0_i32_1 = arith.constant 0 : i32
    return %arg0, %c0_i32, %c0_i32_0 : i32, i32, i32
  }
  func.func @transform_4(%arg0: i32, %arg1: i32) -> (i32, i32, i32) {
    %c0_i32 = arith.constant 0 : i32
    %c0_i32_0 = arith.constant 0 : i32
    %c0_i32_1 = arith.constant 0 : i32
    %c0_i32_2 = arith.constant 0 : i32
    return %c0_i32, %c0_i32_0, %c0_i32_1 : i32, i32, i32
  }
  func.func @transform_5(%arg0: i32, %arg1: i32) -> (i32, i32) {
    %c0_i32 = arith.constant 0 : i32
    %c0_i32_0 = arith.constant 0 : i32
    %c0_i32_1 = arith.constant 0 : i32
    return %c0_i32, %c0_i32_0 : i32, i32
  }
  func.func @transform_6(%arg0: i32, %arg1: i32) -> (i32, i32, i32) {
    %c0_i32 = arith.constant 0 : i32
    %c0_i32_0 = arith.constant 0 : i32
    return %arg0, %arg1, %c0_i32 : i32, i32, i32
  }
  func.func @transform_7(%arg0: i32, %arg1: i32) -> (i32, i32) {
    %c0_i32 = arith.constant 0 : i32
    %c0_i32_0 = arith.constant 0 : i32
    %c0_i32_1 = arith.constant 0 : i32
    return %c0_i32, %c0_i32_0 : i32, i32
  }
}

</mosaic_0001>

<bundles_post_ra>
// kernel: multigcn_forward.1
= control target key start
LH: loop header
LB: loop body
LE: loop exit
PB: predicated region body
PF: predicated region fallthrough
CT: control target
= control target key end

     0   :  { %s2244_s24 = smov 0   ;;  %s2246_s25 = smov 0   ;;  %s2694_s0 = inlined_call_operand.vmem [shape: bf16[128,128], index: 0, kind: input, shape index: {}]   ;;  %s2695_s1 = inlined_call_operand.vmem [shape: bf16[128,128], index: 1, kind: input, shape index: {}]   ;;  %s2696_s2 = inlined_call_operand.vmem [shape: bf16[3,128,128], index: 2, kind: input, shape index: {}]   ;;  %s2697_s3 = inlined_call_operand.vmem [shape: f32[3,1,128], index: 3, kind: input, shape index: {}]   ;;  %s2698_s4 = inlined_call_operand.vmem [shape: bf16[4,128,128], index: 4, kind: input, shape index: {}]   ;;  %s2699_s5 = inlined_call_operand.vmem [shape: f32[1,128], index: 5, kind: input, shape index: {}]   ;;  %s2700_s6 = inlined_call_operand.vmem [shape: bf16[3,128,128], index: 6, kind: output, shape index: {0}]   ;;  %s2701_s7 = inlined_call_operand.vmem [shape: f32[128,128], index: 7, kind: output, shape index: {1}]  }
   0x1   :  { %s2248_s26 = smov 0  }
   0x2 LB: > { %s30_s27 = sadd.s32 1, %s2198_s25  ;;  %p1659_p0 = scmp.ge.s32.totalorder %s2202_s26, 1  ;;  %s2202_s26 = sphi %s2248_s26, %s18_s26   ;;  %s2198_s25 = sphi %s2246_s25, %s2703_s25   ;;  %s2194_s24 = sphi %s2244_s24, %s2702_s24  }
   0x3   : > { %p32_p1 = scmp.ge.s32.totalorder %s30_s27, 3  ;;  %p268_p2 = scmp.lt.s32.totalorder %s2202_s26, 4 }
   0x5   : > { %s2705_s27 = smov (%p32_p1, %s30_s27), 0  ;;  %p269_p3 = pnand %p1659_p0, %p268_p2 }
   0x6   : > { %p318_p4 = scmp.lt.s32.totalorder (!%p269_p3), %s2194_s24, 2  ;;  %p355_p5 = scmp.eq.s32.totalorder (!%p269_p3), %s2194_s24, 0 }
   0x7   : > { %272 = sbr.rel (%p269_p3) target bundleno = 1247 (0x4df), region = 44 }
   0xe   : > { %s2267_s28 = scalar_select %p318_p4, %s2194_s24, 2 }
   0xf   : > { %v2140_v18 = vld [vmem:[%s2694_s0] sm:$0xff] (%p355_p5)   ;;  %v2142_v26 = vld [vmem:[%s2694_s0 + $0x8] sm:$0xff] (%p355_p5)   ;;  %v2144_v28 = vld [vmem:[%s2694_s0 + $0x10] sm:$0xff] (%p355_p5)  }
  0x10   : > { %s1761_s29 = sshll.u32 %s2267_s28, 6  ;;  %s325_s9 = scalar_lea.vmem %s2697_s3, %s2267_s28  ;;  %v2141_v19 = vld [vmem:[%s2694_s0 + $0x20] sm:$0xff] (%p355_p5)   ;;  %1924 = vmatprep.mubr.bf16.mxu0 (%p355_p5), %v2140_v18  ;;  %v2143_v27 = vld [vmem:[%s2694_s0 + $0x28] sm:$0xff] (%p355_p5)   ;;  %v2145_v29 = vld [vmem:[%s2694_s0 + $0x30] sm:$0xff] (%p355_p5)  }
  0x11   : > { %s322_s12 = scalar_lea.vmem %s2696_s2, %s1761_s29  ;;  %s2280_s15 = scalar_lea.vmem %s2700_s6, %s1761_s29  ;;  %1932 = vmatprep.mubr.bf16.mxu1 (%p355_p5), %v2141_v19  ;;  %v2146_v30 = vld [vmem:[%s2694_s0 + $0x18] sm:$0xff] (%p355_p5)  }
  0x12   : > { %v2282_v0 = vld [vmem:[%s322_s12] sm:$0xf]  ;;  %v2284_v1 = vld [vmem:[%s322_s12 + $0x4] sm:$0xf]  ;;  %v2286_v2 = vld [vmem:[%s322_s12 + $0x8] sm:$0xf] }
  0x13   : > { %v2288_v3 = vld [vmem:[%s322_s12 + $0xc] sm:$0xf]  ;;  %v2290_v4 = vld [vmem:[%s322_s12 + $0x10] sm:$0xf]  ;;  %v2292_v5 = vld [vmem:[%s322_s12 + $0x14] sm:$0xf]  ;;  %v1673_v16 = vcombine.low (%p355_p5), %v2282_v0, %v2284_v1 }
  0x14   : > { %v2294_v6 = vld [vmem:[%s322_s12 + $0x18] sm:$0xf]  ;;  %v2296_v7 = vld [vmem:[%s322_s12 + $0x1c] sm:$0xf]  ;;  %v2298_v8 = vld [vmem:[%s322_s12 + $0x20] sm:$0xf]  ;;  %v1674_v17 = vcombine.low (%p355_p5), %v2286_v2, %v2288_v3  ;;  %v1675_v20 = vcombine.low (%p355_p5), %v2290_v4, %v2292_v5 }
  0x15   : > { %v2300_v9 = vld [vmem:[%s322_s12 + $0x24] sm:$0xf]  ;;  %v2302_v10 = vld [vmem:[%s322_s12 + $0x28] sm:$0xf]  ;;  %v2304_v11 = vld [vmem:[%s322_s12 + $0x2c] sm:$0xf]  ;;  %1908 = vmatprep.subr.bf16.mxu0 (%p355_p5), %v1673_v16  ;;  %2068 = vmatprep.subr.bf16.mxu1 (%p355_p5), %v1673_v16  ;;  %v1676_v21 = vcombine.low (%p355_p5), %v2294_v6, %v2296_v7 }
  0x16   : > { %v2306_v12 = vld [vmem:[%s322_s12 + $0x30] sm:$0xf]  ;;  %v2308_v13 = vld [vmem:[%s322_s12 + $0x34] sm:$0xf]  ;;  %v2310_v14 = vld [vmem:[%s322_s12 + $0x38] sm:$0xf]  ;;  %1909 = vmatpush3.bf16.msra.mxu0 (%p355_p5), %v1673_v16  ;;  %2076 = vmatpush3.bf16.msra.mxu1 (%p355_p5), %v1673_v16  ;;  %v1677_v22 = vcombine.low (%p355_p5), %v2298_v8, %v2300_v9  ;;  %v1678_v23 = vcombine.low (%p355_p5), %v2302_v10, %v2304_v11 }
  0x17   : > { %v2312_v15 = vld [vmem:[%s322_s12 + $0x3c] sm:$0xf]  ;;  %359 = sbr.rel (!%p355_p5) target bundleno = 279 (0x117), region = 48  ;;  %1910 = vmatprep.subr.bf16.mxu0 (%p355_p5), %v1674_v17  ;;  %2069 = vmatprep.subr.bf16.mxu1 (%p355_p5), %v1674_v17  ;;  %v1679_v24 = vcombine.low (%p355_p5), %v2306_v12, %v2308_v13 }
  0x18   : > { %v1680_v25 = vcombine.low (%p355_p5), %v2310_v14, %v2312_v15  ;;  %v2147_v31 = vld [vmem:[%s2694_s0 + $0x38] sm:$0xff] (%p355_p5)  }
  0x1a   : > { %1911 = vmatpush3.bf16.msra.mxu0 (%p355_p5), %v1674_v17  ;;  %2077 = vmatpush3.bf16.msra.mxu1 (%p355_p5), %v1674_v17 }
  0x1b   : > { %1912 = vmatprep.subr.bf16.mxu0 (%p355_p5), %v1675_v20  ;;  %2070 = vmatprep.subr.bf16.mxu1 (%p355_p5), %v1675_v20 }
  0x1e   : > { %1913 = vmatpush3.bf16.msra.mxu0 %v1675_v20  ;;  %2078 = vmatpush3.bf16.msra.mxu1 %v1675_v20 }
  0x1f   : > { %1914 = vmatprep.subr.bf16.mxu0 %v1676_v21  ;;  %2071 = vmatprep.subr.bf16.mxu1 %v1676_v21 }
  0x22   : > { %1915 = vmatpush3.bf16.msra.mxu0 %v1676_v21  ;;  %2079 = vmatpush3.bf16.msra.mxu1 %v1676_v21 }
  0x23   : > { %1916 = vmatprep.subr.bf16.mxu0 %v1677_v22  ;;  %2072 = vmatprep.subr.bf16.mxu1 %v1677_v22 }
  0x26   : > { %1917 = vmatpush3.bf16.msra.mxu0 %v1677_v22  ;;  %2080 = vmatpush3.bf16.msra.mxu1 %v1677_v22 }
  0x27   : > { %1918 = vmatprep.subr.bf16.mxu0 %v1678_v23  ;;  %2073 = vmatprep.subr.bf16.mxu1 %v1678_v23 }
  0x2a   : > { %1919 = vmatpush3.bf16.msra.mxu0 %v1678_v23  ;;  %2081 = vmatpush3.bf16.msra.mxu1 %v1678_v23 }
  0x2b   : > { %1920 = vmatprep.subr.bf16.mxu0 %v1679_v24  ;;  %2074 = vmatprep.subr.bf16.mxu1 %v1679_v24 }
  0x2e   : > { %1921 = vmatpush3.bf16.msra.mxu0 %v1679_v24  ;;  %2082 = vmatpush3.bf16.msra.mxu1 %v1679_v24 }
  0x2f   : > { %1922 = vmatprep.subr.bf16.mxu0 %v1680_v25  ;;  %2075 = vmatprep.subr.bf16.mxu1 %v1680_v25 }
  0x32   : > { %1923 = vmatpush3.bf16.msra.mxu0 %v1680_v25  ;;  %2083 = vmatpush3.bf16.msra.mxu1 %v1680_v25 }
  0x35   : > { %1925 = vmatmul.mubr.bf16.vlgmr.msra.gmra.mrb[0].mxu0 %v2142_v26  ;;  %1933 = vmatmul.mubr.bf16.vlgmr.msra.gmra.mrb[0].mxu1 %v2143_v27 }
  0x36   : > { %1928 = vmatprep.mubr.bf16.mxu0 %v2144_v28  ;;  %1936 = vmatprep.mubr.bf16.mxu1 %v2145_v29 }
  0x3d   : > { %1929 = vmatmul.mubr.bf16.gmra.mrb[4].mxu0 %v2146_v30  ;;  %1937 = vmatmul.mubr.bf16.gmra.mrb[4].mxu1 %v2147_v31 }
 0x108   : > { %v1926_v32 = vpop.f32.mrb[0].mxu0  ;;  %v1934_v33 = vpop.f32.mrb[0].mxu1 }
 0x109   : > { %v506_v34 = vpop.f32.mrb[1].mxu0  ;;  %v538_v35 = vpop.f32.mrb[1].mxu1 }
 0x10a   : > { %v1927_v36 = vpop.f32.mrb[2].mxu0  ;;  %v1935_v37 = vpop.f32.mrb[2].mxu1 }
 0x10b   : > { %v570_v38 = vpack.c.bf16 %v1927_v36, %v1926_v32  ;;  %v574_v39 = vpack.c.bf16 %v1935_v37, %v1934_v33  ;;  %v509_v40 = vpop.f32.mrb[3].mxu0  ;;  %v541_v41 = vpop.f32.mrb[3].mxu1 }
 0x10c   : > { %v569_v42 = vpack.c.bf16 %v509_v40, %v506_v34  ;;  %v573_v43 = vpack.c.bf16 %v541_v41, %v538_v35 }
 0x10d   : > { %578 = vst [vmem:[#allocation2 + $0x8] sm:$0xff] %v570_v38  ;;  %582 = vst [vmem:[#allocation2 + $0x28] sm:$0xff] %v574_v39 }
 0x10e   : > { %577 = vst [vmem:[#allocation2] sm:$0xff] %v569_v42  ;;  %581 = vst [vmem:[#allocation2 + $0x20] sm:$0xff] %v573_v43 }
 0x110   : > { %v1930_v44 = vpop.f32.mrb[4].mxu0  ;;  %v1938_v45 = vpop.f32.mrb[4].mxu1 }
 0x111   : > { %v522_v46 = vpop.f32.mrb[5].mxu0  ;;  %v554_v47 = vpop.f32.mrb[5].mxu1 }
 0x112   : > { %v1931_v48 = vpop.f32.mrb[6].mxu0  ;;  %v1939_v49 = vpop.f32.mrb[6].mxu1 }
 0x113   : > { %v572_v50 = vpack.c.bf16 %v1931_v48, %v1930_v44  ;;  %v576_v51 = vpack.c.bf16 %v1939_v49, %v1938_v45  ;;  %v525_v52 = vpop.f32.mrb[7].mxu0  ;;  %v557_v53 = vpop.f32.mrb[7].mxu1 }
 0x114   : > { %v571_v54 = vpack.c.bf16 %v525_v52, %v522_v46  ;;  %v575_v55 = vpack.c.bf16 %v557_v53, %v554_v47 }
 0x115   : > { %580 = vst [vmem:[#allocation2 + $0x18] sm:$0xff] %v572_v50  ;;  %584 = vst [vmem:[#allocation2 + $0x38] sm:$0xff] %v576_v51 }
 0x116   : > { %579 = vst [vmem:[#allocation2 + $0x10] sm:$0xff] %v571_v54  ;;  %583 = vst [vmem:[#allocation2 + $0x30] sm:$0xff] %v575_v55 }
 0x117 PF: > { %p585_p6 = scmp.gt.s32.totalorder %s2194_s24, 0 }
 0x118   : > { %v1682_v56 = vcombine.low (%p585_p6), %v2282_v0, %v2284_v1  ;;  %v1683_v57 = vcombine.low (%p585_p6), %v2286_v2, %v2288_v3  ;;  %v590_v58 = vld [vmem:[#allocation3] sm:$0xff] (%p585_p6)  ;;  %v1684_v60 = vcombine.low (%p585_p6), %v2290_v4, %v2292_v5  ;;  %v1685_v61 = vcombine.low (%p585_p6), %v2294_v6, %v2296_v7  ;;  %v591_v2 = vld [vmem:[#allocation3 + $0x8] sm:$0xff] (%p585_p6)  ;;  %v592_v4 = vld [vmem:[#allocation3 + $0x10] sm:$0xff] (%p585_p6) }
 0x119   : > { %589 = sbr.rel (!%p585_p6) target bundleno = 540 (0x21c), region = 52  ;;  %1956 = vmatprep.mubr.bf16.mxu0 (%p585_p6), %v590_v58  ;;  %v594_v59 = vld [vmem:[#allocation3 + $0x20] sm:$0xff] (%p585_p6)  ;;  %v1686_v62 = vcombine.low (%p585_p6), %v2298_v8, %v2300_v9  ;;  %v1687_v63 = vcombine.low (%p585_p6), %v2302_v10, %v2304_v11  ;;  %v1688_v0 = vcombine.low (%p585_p6), %v2306_v12, %v2308_v13  ;;  %v1689_v1 = vcombine.low (%p585_p6), %v2310_v14, %v2312_v15  ;;  %v595_v3 = vld [vmem:[#allocation3 + $0x28] sm:$0xff] (%p585_p6)  ;;  %v596_v5 = vld [vmem:[#allocation3 + $0x30] sm:$0xff] (%p585_p6) }
 0x11a   : > { %1940 = vmatprep.subr.bf16.mxu0 (%p585_p6), %v1682_v56  ;;  %2084 = vmatprep.subr.bf16.mxu1 (%p585_p6), %v1682_v56  ;;  %v593_v6 = vld [vmem:[#allocation3 + $0x18] sm:$0xff] (%p585_p6) }
 0x11b   : > { %1941 = vmatpush3.bf16.msra.mxu0 (%p585_p6), %v1682_v56  ;;  %2092 = vmatpush3.bf16.msra.mxu1 (%p585_p6), %v1682_v56  ;;  %v597_v7 = vld [vmem:[#allocation3 + $0x38] sm:$0xff] (%p585_p6) }
 0x11c   : > { %1942 = vmatprep.subr.bf16.mxu0 (%p585_p6), %v1683_v57  ;;  %2085 = vmatprep.subr.bf16.mxu1 (%p585_p6), %v1683_v57 }
 0x11d   : > { %1964 = vmatprep.mubr.bf16.mxu1 (%p585_p6), %v594_v59 }
 0x11f   : > { %1943 = vmatpush3.bf16.msra.mxu0 (%p585_p6), %v1683_v57  ;;  %2093 = vmatpush3.bf16.msra.mxu1 (%p585_p6), %v1683_v57 }
 0x120   : > { %1944 = vmatprep.subr.bf16.mxu0 %v1684_v60  ;;  %2086 = vmatprep.subr.bf16.mxu1 %v1684_v60 }
 0x123   : > { %1945 = vmatpush3.bf16.msra.mxu0 %v1684_v60  ;;  %2094 = vmatpush3.bf16.msra.mxu1 %v1684_v60 }
 0x124   : > { %1946 = vmatprep.subr.bf16.mxu0 %v1685_v61  ;;  %2087 = vmatprep.subr.bf16.mxu1 %v1685_v61 }
 0x127   : > { %1947 = vmatpush3.bf16.msra.mxu0 %v1685_v61  ;;  %2095 = vmatpush3.bf16.msra.mxu1 %v1685_v61 }
 0x128   : > { %1948 = vmatprep.subr.bf16.mxu0 %v1686_v62  ;;  %2088 = vmatprep.subr.bf16.mxu1 %v1686_v62 }
 0x12b   : > { %1949 = vmatpush3.bf16.msra.mxu0 %v1686_v62  ;;  %2096 = vmatpush3.bf16.msra.mxu1 %v1686_v62 }
 0x12c   : > { %1950 = vmatprep.subr.bf16.mxu0 %v1687_v63  ;;  %2089 = vmatprep.subr.bf16.mxu1 %v1687_v63 }
 0x12f   : > { %1951 = vmatpush3.bf16.msra.mxu0 %v1687_v63  ;;  %2097 = vmatpush3.bf16.msra.mxu1 %v1687_v63 }
 0x130   : > { %1952 = vmatprep.subr.bf16.mxu0 %v1688_v0  ;;  %2090 = vmatprep.subr.bf16.mxu1 %v1688_v0 }
 0x133   : > { %1953 = vmatpush3.bf16.msra.mxu0 %v1688_v0  ;;  %2098 = vmatpush3.bf16.msra.mxu1 %v1688_v0 }
 0x134   : > { %1954 = vmatprep.subr.bf16.mxu0 %v1689_v1  ;;  %2091 = vmatprep.subr.bf16.mxu1 %v1689_v1 }
 0x137   : > { %1955 = vmatpush3.bf16.msra.mxu0 %v1689_v1  ;;  %2099 = vmatpush3.bf16.msra.mxu1 %v1689_v1 }
 0x13a   : > { %1957 = vmatmul.mubr.bf16.vlgmr.msra.gmra.mrb[0].mxu0 %v591_v2  ;;  %1965 = vmatmul.mubr.bf16.vlgmr.msra.gmra.mrb[0].mxu1 %v595_v3 }
 0x13b   : > { %1960 = vmatprep.mubr.bf16.mxu0 %v592_v4  ;;  %1968 = vmatprep.mubr.bf16.mxu1 %v596_v5 }
 0x142   : > { %1961 = vmatmul.mubr.bf16.gmra.mrb[4].mxu0 %v593_v6  ;;  %1969 = vmatmul.mubr.bf16.gmra.mrb[4].mxu1 %v597_v7 }
 0x20d   : > { %v1958_v8 = vpop.f32.mrb[0].mxu0  ;;  %v1966_v9 = vpop.f32.mrb[0].mxu1 }
 0x20e   : > { %v680_v10 = vpop.f32.mrb[1].mxu0  ;;  %v712_v11 = vpop.f32.mrb[1].mxu1 }
 0x20f   : > { %v1959_v12 = vpop.f32.mrb[2].mxu0  ;;  %v1967_v13 = vpop.f32.mrb[2].mxu1 }
 0x210   : > { %v744_v14 = vpack.c.bf16 %v1959_v12, %v1958_v8  ;;  %v748_v15 = vpack.c.bf16 %v1967_v13, %v1966_v9  ;;  %v683_v16 = vpop.f32.mrb[3].mxu0  ;;  %v715_v17 = vpop.f32.mrb[3].mxu1 }
 0x211   : > { %v743_v18 = vpack.c.bf16 %v683_v16, %v680_v10  ;;  %v747_v19 = vpack.c.bf16 %v715_v17, %v712_v11 }
 0x212   : > { %752 = vst [vmem:[#allocation2 + $0x8] sm:$0xff] %v744_v14  ;;  %756 = vst [vmem:[#allocation2 + $0x28] sm:$0xff] %v748_v15 }
 0x213   : > { %751 = vst [vmem:[#allocation2] sm:$0xff] %v743_v18  ;;  %755 = vst [vmem:[#allocation2 + $0x20] sm:$0xff] %v747_v19 }
 0x215   : > { %v1962_v20 = vpop.f32.mrb[4].mxu0  ;;  %v1970_v21 = vpop.f32.mrb[4].mxu1 }
 0x216   : > { %v696_v22 = vpop.f32.mrb[5].mxu0  ;;  %v728_v23 = vpop.f32.mrb[5].mxu1 }
 0x217   : > { %v1963_v24 = vpop.f32.mrb[6].mxu0  ;;  %v1971_v25 = vpop.f32.mrb[6].mxu1 }
 0x218   : > { %v746_v26 = vpack.c.bf16 %v1963_v24, %v1962_v20  ;;  %v750_v27 = vpack.c.bf16 %v1971_v25, %v1970_v21  ;;  %v699_v28 = vpop.f32.mrb[7].mxu0  ;;  %v731_v29 = vpop.f32.mrb[7].mxu1 }
 0x219   : > { %v745_v30 = vpack.c.bf16 %v699_v28, %v696_v22  ;;  %v749_v31 = vpack.c.bf16 %v731_v29, %v728_v23 }
 0x21a   : > { %754 = vst [vmem:[#allocation2 + $0x18] sm:$0xff] %v746_v26  ;;  %758 = vst [vmem:[#allocation2 + $0x38] sm:$0xff] %v750_v27 }
 0x21b   : > { %753 = vst [vmem:[#allocation2 + $0x10] sm:$0xff] %v745_v30  ;;  %757 = vst [vmem:[#allocation2 + $0x30] sm:$0xff] %v749_v31 }
 0x21c PF: > { %v775_v32 = vld [vmem:[#allocation2] sm:$0xff]  ;;  %v776_v33 = vld [vmem:[#allocation2 + $0x8] sm:$0xff]  ;;  %s1715_s18 = sshll.u32 %s2194_s24, 6  ;;  %v2150_v48 = vld [vmem:[%s2695_s1 + $0x10] sm:$0xff]   ;;  %p1740_p7 = scmp.ne.s32.totalorder %s2194_s24, 0 }
 0x21d   : > { %1972 = vmatprep.subr.bf16.mxu0 %v775_v32  ;;  %v2148_v34 = vld [vmem:[%s2695_s1] sm:$0xff]   ;;  %s2380_s21 = scalar_lea.vmem %s2698_s4, %s1715_s18  ;;  %v780_v41 = vld [vmem:[#allocation2 + $0x28] sm:$0xff]  ;;  %v2151_v49 = vld [vmem:[%s2695_s1 + $0x18] sm:$0xff]  }
 0x21e   : > { %1973 = vmatpush3.bf16.msra.mxu0 %v775_v32  ;;  %1988 = vmatprep.mubr.bf16.mxu0 %v2148_v34  ;;  %v779_v37 = vld [vmem:[#allocation2 + $0x20] sm:$0xff]  ;;  %v2157_v39 = vld [vmem:[%s2380_s21 + $0x48] sm:$0xff]   ;;  %v2158_v40 = vld [vmem:[%s2380_s21 + $0x50] sm:$0xff]  }
 0x21f   : > { %1974 = vmatprep.subr.bf16.mxu0 %v776_v33  ;;  %v2156_v38 = vld [vmem:[%s2380_s21 + $0x40] sm:$0xff]   ;;  %v2159_v42 = vld [vmem:[%s2380_s21 + $0x58] sm:$0xff]   ;;  %v2161_v46 = vld [vmem:[%s2380_s21 + $0x68] sm:$0xff]  }
 0x220   : > { %2004 = vmatprep.subr.bf16.mxu1 %v2156_v38  ;;  %v2160_v44 = vld [vmem:[%s2380_s21 + $0x60] sm:$0xff]   ;;  %v2149_v47 = vld [vmem:[%s2695_s1 + $0x8] sm:$0xff]   ;;  %v2154_v52 = vld [vmem:[%s2695_s1 + $0x30] sm:$0xff]  }
 0x221   : > { %v778_v36 = vld [vmem:[#allocation2 + $0x18] sm:$0xff]  ;;  %2005 = vmatpush3.bf16.msra.mxu1 %v2156_v38  ;;  %v2152_v50 = vld [vmem:[%s2695_s1 + $0x20] sm:$0xff]   ;;  %v2153_v51 = vld [vmem:[%s2695_s1 + $0x28] sm:$0xff]  }
 0x222   : > { %v777_v35 = vld [vmem:[#allocation2 + $0x10] sm:$0xff]  ;;  %1975 = vmatpush3.bf16.msra.mxu0 %v776_v33  ;;  %2006 = vmatprep.subr.bf16.mxu1 %v2157_v39  ;;  %v782_v45 = vld [vmem:[#allocation2 + $0x38] sm:$0xff]  ;;  %v1690_v57 = vld [vmem:[%s325_s9] ss:$0 sm:$0xff] }
 0x223   : > { %1976 = vmatprep.subr.bf16.mxu0 %v777_v35  ;;  %v781_v43 = vld [vmem:[#allocation2 + $0x30] sm:$0xff]  ;;  %v2155_v53 = vld [vmem:[%s2695_s1 + $0x38] sm:$0xff]  }
 0x224   : > { %v2162_v54 = vld [vmem:[%s2380_s21 + $0x70] sm:$0xff]   ;;  %v2163_v55 = vld [vmem:[%s2380_s21 + $0x78] sm:$0xff]  }
 0x225   : > { %2007 = vmatpush3.bf16.msra.mxu1 %v2157_v39 }
 0x226   : > { %1977 = vmatpush3.bf16.msra.mxu0 %v777_v35  ;;  %2008 = vmatprep.subr.bf16.mxu1 %v2158_v40 }
 0x227   : > { %1978 = vmatprep.subr.bf16.mxu0 %v778_v36 }
 0x229   : > { %2009 = vmatpush3.bf16.msra.mxu1 %v2158_v40 }
 0x22a   : > { %1979 = vmatpush3.bf16.msra.mxu0 %v778_v36  ;;  %2010 = vmatprep.subr.bf16.mxu1 %v2159_v42 }
 0x22b   : > { %1980 = vmatprep.subr.bf16.mxu0 %v779_v37 }
 0x22d   : > { %2011 = vmatpush3.bf16.msra.mxu1 %v2159_v42 }
 0x22e   : > { %1981 = vmatpush3.bf16.msra.mxu0 %v779_v37  ;;  %2012 = vmatprep.subr.bf16.mxu1 %v2160_v44 }
 0x22f   : > { %1982 = vmatprep.subr.bf16.mxu0 %v780_v41 }
 0x231   : > { %2013 = vmatpush3.bf16.msra.mxu1 %v2160_v44 }
 0x232   : > { %1983 = vmatpush3.bf16.msra.mxu0 %v780_v41  ;;  %2014 = vmatprep.subr.bf16.mxu1 %v2161_v46 }
 0x233   : > { %1984 = vmatprep.subr.bf16.mxu0 %v781_v43 }
 0x235   : > { %2015 = vmatpush3.bf16.msra.mxu1 %v2161_v46 }
 0x236   : > { %1985 = vmatpush3.bf16.msra.mxu0 %v781_v43  ;;  %2016 = vmatprep.subr.bf16.mxu1 %v2162_v54 }
 0x237   : > { %1986 = vmatprep.subr.bf16.mxu0 %v782_v45 }
 0x239   : > { %2017 = vmatpush3.bf16.msra.mxu1 %v2162_v54  ;;  %v2173_v54 = vld [vmem:[%s2694_s0 + $0x20] sm:$0xff] (!%p1740_p7)  }
 0x23a   : > { %1987 = vmatpush3.bf16.msra.mxu0 %v782_v45  ;;  %2018 = vmatprep.subr.bf16.mxu1 %v2163_v55 }
 0x23d   : > { %1989 = vmatmul.mubr.bf16.vlgmr.msra.gmra.mrb[0].mxu0 %v2149_v47  ;;  %2019 = vmatpush3.bf16.msra.mxu1 %v2163_v55  ;;  %v2168_v55 = vld [vmem:[%s2698_s4 + $0x20] sm:$0xff] (!%p1740_p7)  }
 0x23e   : > { %1992 = vmatprep.mubr.bf16.mxu0 %v2150_v48 }
 0x245   : > { %1993 = vmatmul.mubr.bf16.gmra.mrb[4].mxu0 %v2151_v49  ;;  %v2164_v49 = vld [vmem:[%s2698_s4] sm:$0xff] (!%p1740_p7)  }
 0x246   : > { %1996 = vmatprep.mubr.bf16.mxu0 %v2152_v50  ;;  %v2165_v50 = vld [vmem:[%s2698_s4 + $0x8] sm:$0xff] (!%p1740_p7)   ;;  %2036 = vmatprep.subr.bf16.mxu0 (!%p1740_p7), %v2164_v49 }
 0x247   : > { %2100 = vmatprep.subr.bf16.mxu1 (!%p1740_p7), %v2164_v49  ;;  %2037 = vmatpush3.bf16.msra.mxu0 (!%p1740_p7), %v2164_v49 }
 0x248   : > { %2038 = vmatprep.subr.bf16.mxu0 (!%p1740_p7), %v2165_v50 }
 0x24b   : > { %2039 = vmatpush3.bf16.msra.mxu0 (!%p1740_p7), %v2165_v50 }
 0x24d   : > { %1997 = vmatmul.mubr.bf16.gmra.mrb[8].mxu0 %v2153_v51  ;;  %v2166_v51 = vld [vmem:[%s2698_s4 + $0x10] sm:$0xff] (!%p1740_p7)  }
 0x24e   : > { %2000 = vmatprep.mubr.bf16.mxu0 %v2154_v52  ;;  %v2167_v52 = vld [vmem:[%s2698_s4 + $0x18] sm:$0xff] (!%p1740_p7)   ;;  %2040 = vmatprep.subr.bf16.mxu0 (!%p1740_p7), %v2166_v51 }
 0x24f   : > { %2041 = vmatpush3.bf16.msra.mxu0 (!%p1740_p7), %v2166_v51 }
 0x250   : > { %2042 = vmatprep.subr.bf16.mxu0 (!%p1740_p7), %v2167_v52 }
 0x253   : > { %2043 = vmatpush3.bf16.msra.mxu0 (!%p1740_p7), %v2167_v52 }
 0x254   : > { %2044 = vmatprep.subr.bf16.mxu0 (!%p1740_p7), %v2168_v55 }
 0x255   : > { %2001 = vmatmul.mubr.bf16.gmra.mrb[12].mxu0 %v2155_v53  ;;  %v2172_v53 = vld [vmem:[%s2694_s0] sm:$0xff] (!%p1740_p7)  }
 0x256   : > { %2052 = vmatprep.mubr.bf16.mxu0 (!%p1740_p7), %v2172_v53 }
 0x257   : > { %2045 = vmatpush3.bf16.msra.mxu0 (!%p1740_p7), %v2168_v55 }
 0x310   : > { %v1990_v56 = vpop.f32.mrb[0].mxu0 }
 0x311   : > { %v872_v58 = vpop.f32.mrb[1].mxu0  ;;  %v881_v60 = vadd.f32 %v1990_v56, %v1690_v57  ;;  %v2169_v56 = vld [vmem:[%s2698_s4 + $0x28] sm:$0xff] (!%p1740_p7)  }
 0x312   : > { %v1991_v59 = vpop.f32.mrb[2].mxu0  ;;  %v873_v63 = vadd.f32 %v1690_v57, %v872_v58  ;;  %2046 = vmatprep.subr.bf16.mxu0 (!%p1740_p7), %v2169_v56  ;;  %v2171_v58 = vld [vmem:[%s2698_s4 + $0x38] sm:$0xff] (!%p1740_p7)  }
 0x313   : > { %v884_v61 = vadd.f32 %v1991_v59, %v1690_v57  ;;  %v875_v62 = vpop.f32.mrb[3].mxu0  ;;  %2047 = vmatpush3.bf16.msra.mxu0 (!%p1740_p7), %v2169_v56  ;;  %v2174_v59 = vld [vmem:[%s2694_s0 + $0x8] sm:$0xff] (!%p1740_p7)  }
 0x314   : > { %v876_v0 = vadd.f32 %v1690_v57, %v875_v62  ;;  %v2177_v62 = vld [vmem:[%s2694_s0 + $0x30] sm:$0xff] (!%p1740_p7)  }
 0x315   : > { %v936_v1 = vpack.c.bf16 %v884_v61, %v881_v60  ;;  %v2175_v60 = vld [vmem:[%s2694_s0 + $0x28] sm:$0xff] (!%p1740_p7)   ;;  %v2176_v61 = vld [vmem:[%s2694_s0 + $0x10] sm:$0xff] (!%p1740_p7)  }
 0x316   : > { %v935_v2 = vpack.c.bf16 %v876_v0, %v873_v63  ;;  %v2178_v63 = vld [vmem:[%s2694_s0 + $0x18] sm:$0xff] (!%p1740_p7)  }
 0x317   : > { %948 = vst [vmem:[#allocation3 + $0x8] sm:$0xff] %v936_v1  ;;  %1821 = vst [vmem:[%s2280_s15 + $0x8] sm:$0xff] %v936_v1   ;;  %v2179_v0 = vld [vmem:[%s2694_s0 + $0x38] sm:$0xff] (!%p1740_p7)  }
 0x318   : > { %947 = vst [vmem:[#allocation3] sm:$0xff] %v935_v2  ;;  %1785 = vst [vmem:[%s2280_s15] sm:$0xff] %v935_v2   ;;  %v1994_v3 = vpop.f32.mrb[4].mxu0  ;;  %2020 = vmatprep.mubr.bf16.mxu1 %v935_v2 }
 0x319   : > { %v888_v4 = vpop.f32.mrb[5].mxu0  ;;  %2021 = vmatmul.mubr.bf16.vlgmr.msra.gmra.mrb[0].mxu1 %v936_v1  ;;  %v897_v6 = vadd.f32 %v1994_v3, %v1690_v57  ;;  %v1757_v1 = vld [vmem:[%s2699_s5] ss:$0 sm:$0xff] (!%p1740_p7) }
 0x31a   : > { %v1995_v5 = vpop.f32.mrb[6].mxu0  ;;  %v889_v9 = vadd.f32 %v1690_v57, %v888_v4  ;;  %2108 = vmatpush3.bf16.msra.mxu1 (!%p1740_p7), %v2164_v49 }
 0x31b   : > { %v900_v7 = vadd.f32 %v1995_v5, %v1690_v57  ;;  %v891_v8 = vpop.f32.mrb[7].mxu0  ;;  %2101 = vmatprep.subr.bf16.mxu1 (!%p1740_p7), %v2165_v50 }
 0x31c   : > { %v892_v10 = vadd.f32 %v1690_v57, %v891_v8 }
 0x31d   : > { %v938_v11 = vpack.c.bf16 %v900_v7, %v897_v6 }
 0x31e   : > { %v937_v12 = vpack.c.bf16 %v892_v10, %v889_v9  ;;  %2109 = vmatpush3.bf16.msra.mxu1 (!%p1740_p7), %v2165_v50 }
 0x31f   : > { %950 = vst [vmem:[#allocation3 + $0x18] sm:$0xff] %v938_v11  ;;  %1823 = vst [vmem:[%s2280_s15 + $0x18] sm:$0xff] %v938_v11   ;;  %2102 = vmatprep.subr.bf16.mxu1 (!%p1740_p7), %v2166_v51 }
 0x320   : > { %949 = vst [vmem:[#allocation3 + $0x10] sm:$0xff] %v937_v12  ;;  %1822 = vst [vmem:[%s2280_s15 + $0x10] sm:$0xff] %v937_v12   ;;  %v1998_v13 = vpop.f32.mrb[8].mxu0  ;;  %2024 = vmatprep.mubr.bf16.mxu1 %v937_v12 }
 0x321   : > { %v904_v14 = vpop.f32.mrb[9].mxu0  ;;  %2025 = vmatmul.mubr.bf16.gmra.mrb[4].mxu1 %v938_v11  ;;  %v913_v16 = vadd.f32 %v1998_v13, %v1690_v57 }
 0x322   : > { %v1999_v15 = vpop.f32.mrb[10].mxu0  ;;  %v905_v19 = vadd.f32 %v1690_v57, %v904_v14  ;;  %2110 = vmatpush3.bf16.msra.mxu1 (!%p1740_p7), %v2166_v51 }
 0x323   : > { %v916_v17 = vadd.f32 %v1999_v15, %v1690_v57  ;;  %v907_v18 = vpop.f32.mrb[11].mxu0  ;;  %2103 = vmatprep.subr.bf16.mxu1 (!%p1740_p7), %v2167_v52 }
 0x324   : > { %v908_v20 = vadd.f32 %v1690_v57, %v907_v18 }
 0x325   : > { %v940_v21 = vpack.c.bf16 %v916_v17, %v913_v16 }
 0x326   : > { %v939_v22 = vpack.c.bf16 %v908_v20, %v905_v19  ;;  %2111 = vmatpush3.bf16.msra.mxu1 (!%p1740_p7), %v2167_v52 }
 0x327   : > { %952 = vst [vmem:[#allocation3 + $0x28] sm:$0xff] %v940_v21  ;;  %1825 = vst [vmem:[%s2280_s15 + $0x28] sm:$0xff] %v940_v21   ;;  %2104 = vmatprep.subr.bf16.mxu1 (!%p1740_p7), %v2168_v55 }
 0x328   : > { %951 = vst [vmem:[#allocation3 + $0x20] sm:$0xff] %v939_v22  ;;  %1824 = vst [vmem:[%s2280_s15 + $0x20] sm:$0xff] %v939_v22   ;;  %v2002_v23 = vpop.f32.mrb[12].mxu0  ;;  %2028 = vmatprep.mubr.bf16.mxu1 %v939_v22 }
 0x329   : > { %v920_v24 = vpop.f32.mrb[13].mxu0  ;;  %2029 = vmatmul.mubr.bf16.gmra.mrb[8].mxu1 %v940_v21  ;;  %v929_v26 = vadd.f32 %v2002_v23, %v1690_v57 }
 0x32a   : > { %v2003_v25 = vpop.f32.mrb[14].mxu0  ;;  %v921_v29 = vadd.f32 %v1690_v57, %v920_v24  ;;  %2112 = vmatpush3.bf16.msra.mxu1 (!%p1740_p7), %v2168_v55 }
 0x32b   : > { %v932_v27 = vadd.f32 %v2003_v25, %v1690_v57  ;;  %v923_v28 = vpop.f32.mrb[15].mxu0  ;;  %2105 = vmatprep.subr.bf16.mxu1 (!%p1740_p7), %v2169_v56 }
 0x32c   : > { %v924_v30 = vadd.f32 %v1690_v57, %v923_v28  ;;  %v2170_v57 = vld [vmem:[%s2698_s4 + $0x30] sm:$0xff] (!%p1740_p7)  }
 0x32d   : > { %v942_v31 = vpack.c.bf16 %v932_v27, %v929_v26  ;;  %2048 = vmatprep.subr.bf16.mxu0 (!%p1740_p7), %v2170_v57 }
 0x32e   : > { %v941_v32 = vpack.c.bf16 %v924_v30, %v921_v29  ;;  %2113 = vmatpush3.bf16.msra.mxu1 (!%p1740_p7), %v2169_v56  ;;  %2049 = vmatpush3.bf16.msra.mxu0 (!%p1740_p7), %v2170_v57 }
 0x32f   : > { %954 = vst [vmem:[#allocation3 + $0x38] sm:$0xff] %v942_v31  ;;  %1827 = vst [vmem:[%s2280_s15 + $0x38] sm:$0xff] %v942_v31   ;;  %2106 = vmatprep.subr.bf16.mxu1 (!%p1740_p7), %v2170_v57  ;;  %2050 = vmatprep.subr.bf16.mxu0 (!%p1740_p7), %v2171_v58 }
 0x330   : > { %953 = vst [vmem:[#allocation3 + $0x30] sm:$0xff] %v941_v32  ;;  %1826 = vst [vmem:[%s2280_s15 + $0x30] sm:$0xff] %v941_v32   ;;  %2032 = vmatprep.mubr.bf16.mxu1 %v941_v32 }
 0x331   : > { %2033 = vmatmul.mubr.bf16.gmra.mrb[12].mxu1 %v942_v31 }
 0x332   : > { %2060 = vmatprep.mubr.bf16.mxu1 (!%p1740_p7), %v2173_v54  ;;  %2114 = vmatpush3.bf16.msra.mxu1 (!%p1740_p7), %v2170_v57 }
 0x333   : > { %2107 = vmatprep.subr.bf16.mxu1 (!%p1740_p7), %v2171_v58  ;;  %2051 = vmatpush3.bf16.msra.mxu0 (!%p1740_p7), %v2171_v58 }
 0x336   : > { %2115 = vmatpush3.bf16.msra.mxu1 (!%p1740_p7), %v2171_v58  ;;  %2053 = vmatmul.mubr.bf16.vlgmr.msra.gmra.mrb[0].mxu0 (!%p1740_p7), %v2174_v59 }
 0x337   : > { %2056 = vmatprep.mubr.bf16.mxu0 (!%p1740_p7), %v2176_v61 }
 0x33e   : > { %2057 = vmatmul.mubr.bf16.gmra.mrb[4].mxu0 (!%p1740_p7), %v2178_v63 }
 0x3ec   : > { %v2424_v33 = vpop.f32.mrb[0].mxu1 }
 0x3ed   : > { %v2426_v34 = vpop.f32.mrb[1].mxu1 }
 0x3ee   : > { %v2428_v35 = vpop.f32.mrb[2].mxu1 }
 0x3ef   : > { %v2430_v36 = vpop.f32.mrb[3].mxu1  ;;  %2061 = vmatmul.mubr.bf16.vlgmr.msra.gmra.mrb[0].mxu1 (!%p1740_p7), %v2175_v60 }
 0x3f0   : > { %2064 = vmatprep.mubr.bf16.mxu1 (!%p1740_p7), %v2177_v62 }
 0x3f4   : > { %v2432_v37 = vpop.f32.mrb[4].mxu1 }
 0x3f5   : > { %v2434_v38 = vpop.f32.mrb[5].mxu1 }
 0x3f6   : > { %v2436_v39 = vpop.f32.mrb[6].mxu1 }
 0x3f7   : > { %v2438_v40 = vpop.f32.mrb[7].mxu1  ;;  %2065 = vmatmul.mubr.bf16.gmra.mrb[4].mxu1 (!%p1740_p7), %v2179_v0 }
 0x3fc   : > { %v2440_v41 = vpop.f32.mrb[8].mxu1 }
 0x3fd   : > { %v2442_v42 = vpop.f32.mrb[9].mxu1 }
 0x3fe   : > { %v2444_v43 = vpop.f32.mrb[10].mxu1 }
 0x3ff   : > { %v2446_v44 = vpop.f32.mrb[11].mxu1 }
 0x401   : > { %1194 = sbr.rel (%p1740_p7) target bundleno = 1235 (0x4d3), region = 56 }
 0x404   : > { %v2448_v45 = vpop.f32.mrb[12].mxu1 }
 0x405   : > { %v2450_v46 = vpop.f32.mrb[13].mxu1 }
 0x406   : > { %v2452_v47 = vpop.f32.mrb[14].mxu1 }
 0x407   : > { %v2454_v48 = vpop.f32.mrb[15].mxu1 }
 0x409   : > { %v2054_v2 = vpop.f32.mrb[0].mxu0 }
 0x40a   : > { %v1433_v4 = vadd.f32 %v2054_v2, %v1757_v1  ;;  %v1362_v6 = vpop.f32.mrb[1].mxu0 }
 0x40b   : > { %v1431_v8 = vadd.f32 %v1757_v1, %v1362_v6  ;;  %v2055_v10 = vpop.f32.mrb[2].mxu0 }
 0x40c   : > { %v1449_v12 = vadd.f32 %v2424_v33, %v1433_v4  ;;  %v1434_v14 = vadd.f32 %v2055_v10, %v1757_v1  ;;  %v1365_v16 = vpop.f32.mrb[3].mxu0 }
 0x40d   : > { %v1447_v18 = vadd.f32 %v1431_v8, %v2426_v34  ;;  %v1432_v20 = vadd.f32 %v1757_v1, %v1365_v16 }
 0x40e   : > { %1466 = vst [vmem:[%s2701_s7 + $0x10] sm:$0xff] %v1449_v12  ;;  %v1450_v22 = vadd.f32 %v2428_v35, %v1434_v14 }
 0x40f   : > { %1464 = vst [vmem:[%s2701_s7] sm:$0xff] %v1447_v18  ;;  %v1448_v24 = vadd.f32 %v1432_v20, %v2430_v36 }
 0x410   : > { %1467 = vst [vmem:[%s2701_s7 + $0x18] sm:$0xff] %v1450_v22 }
 0x411   : > { %1465 = vst [vmem:[%s2701_s7 + $0x8] sm:$0xff] %v1448_v24  ;;  %v2058_v26 = vpop.f32.mrb[4].mxu0 }
 0x412   : > { %v1437_v28 = vadd.f32 %v2058_v26, %v1757_v1  ;;  %v1378_v30 = vpop.f32.mrb[5].mxu0 }
 0x413   : > { %v1435_v32 = vadd.f32 %v1757_v1, %v1378_v30  ;;  %v2059_v50 = vpop.f32.mrb[6].mxu0 }
 0x414   : > { %v1453_v52 = vadd.f32 %v2432_v37, %v1437_v28  ;;  %v1438_v54 = vadd.f32 %v2059_v50, %v1757_v1  ;;  %v1381_v56 = vpop.f32.mrb[7].mxu0 }
 0x415   : > { %v1451_v58 = vadd.f32 %v1435_v32, %v2434_v38  ;;  %v1436_v60 = vadd.f32 %v1757_v1, %v1381_v56 }
 0x416   : > { %1470 = vst [vmem:[%s2701_s7 + $0x30] sm:$0xff] %v1453_v52  ;;  %v1454_v62 = vadd.f32 %v2436_v39, %v1438_v54 }
 0x417   : > { %1468 = vst [vmem:[%s2701_s7 + $0x20] sm:$0xff] %v1451_v58  ;;  %v1452_v0 = vadd.f32 %v1436_v60, %v2438_v40 }
 0x418   : > { %1471 = vst [vmem:[%s2701_s7 + $0x38] sm:$0xff] %v1454_v62 }
 0x419   : > { %1469 = vst [vmem:[%s2701_s7 + $0x28] sm:$0xff] %v1452_v0 }
 0x4c2   : > { %v2062_v3 = vpop.f32.mrb[0].mxu1 }
 0x4c3   : > { %v1441_v5 = vadd.f32 %v2062_v3, %v1757_v1  ;;  %v1394_v7 = vpop.f32.mrb[1].mxu1 }
 0x4c4   : > { %v1439_v9 = vadd.f32 %v1757_v1, %v1394_v7  ;;  %v2063_v11 = vpop.f32.mrb[2].mxu1 }
 0x4c5   : > { %v1457_v13 = vadd.f32 %v2440_v41, %v1441_v5  ;;  %v1442_v15 = vadd.f32 %v2063_v11, %v1757_v1  ;;  %v1397_v17 = vpop.f32.mrb[3].mxu1 }
 0x4c6   : > { %v1455_v19 = vadd.f32 %v1439_v9, %v2442_v42  ;;  %v1440_v21 = vadd.f32 %v1757_v1, %v1397_v17 }
 0x4c7   : > { %1474 = vst [vmem:[%s2701_s7 + $0x50] sm:$0xff] %v1457_v13  ;;  %v1458_v23 = vadd.f32 %v2444_v43, %v1442_v15 }
 0x4c8   : > { %1472 = vst [vmem:[%s2701_s7 + $0x40] sm:$0xff] %v1455_v19  ;;  %v1456_v25 = vadd.f32 %v1440_v21, %v2446_v44 }
 0x4c9   : > { %1475 = vst [vmem:[%s2701_s7 + $0x58] sm:$0xff] %v1458_v23 }
 0x4ca   : > { %1473 = vst [vmem:[%s2701_s7 + $0x48] sm:$0xff] %v1456_v25  ;;  %v2066_v27 = vpop.f32.mrb[4].mxu1 }
 0x4cb   : > { %v1445_v29 = vadd.f32 %v2066_v27, %v1757_v1  ;;  %v1410_v31 = vpop.f32.mrb[5].mxu1 }
 0x4cc   : > { %v1443_v49 = vadd.f32 %v1757_v1, %v1410_v31  ;;  %v2067_v51 = vpop.f32.mrb[6].mxu1 }
 0x4cd   : > { %v1461_v53 = vadd.f32 %v2448_v45, %v1445_v29  ;;  %v1446_v55 = vadd.f32 %v2067_v51, %v1757_v1  ;;  %v1413_v57 = vpop.f32.mrb[7].mxu1 }
 0x4ce   : > { %v1459_v59 = vadd.f32 %v1443_v49, %v2450_v46  ;;  %v1444_v61 = vadd.f32 %v1757_v1, %v1413_v57 }
 0x4cf   : > { %1478 = vst [vmem:[%s2701_s7 + $0x70] sm:$0xff] %v1461_v53  ;;  %v1462_v63 = vadd.f32 %v2452_v47, %v1446_v55 }
 0x4d0   : > { %1476 = vst [vmem:[%s2701_s7 + $0x60] sm:$0xff] %v1459_v59  ;;  %v1460_v1 = vadd.f32 %v1444_v61, %v2454_v48 }
 0x4d1   : > { %1479 = vst [vmem:[%s2701_s7 + $0x78] sm:$0xff] %v1462_v63 }
 0x4d2   : > { %1477 = vst [vmem:[%s2701_s7 + $0x68] sm:$0xff] %v1460_v1 }
 0x4d3 PF: > { %p1758_p8 = scmp.le.s32.totalorder %s2194_s24, 0 }
 0x4d4   : > { %v1484_v2 = vld [vmem:[%s2701_s7] sm:$0xff] (!%p1758_p8)  ;;  %v1485_v3 = vld [vmem:[%s2701_s7 + $0x8] sm:$0xff] (!%p1758_p8)  ;;  %v1486_v4 = vld [vmem:[%s2701_s7 + $0x10] sm:$0xff] (!%p1758_p8) }
 0x4d5   : > { %1482 = sbr.rel (%p1758_p8) target bundleno = 1247 (0x4df), region = 60  ;;  %v1500_v5 = vadd.f32 (!%p1758_p8), %v1484_v2, %v2426_v34  ;;  %v1501_v6 = vadd.f32 (!%p1758_p8), %v1485_v3, %v2430_v36  ;;  %v1502_v7 = vadd.f32 (!%p1758_p8), %v2424_v33, %v1486_v4  ;;  %v1487_v8 = vld [vmem:[%s2701_s7 + $0x18] sm:$0xff] (!%p1758_p8)  ;;  %v1488_v9 = vld [vmem:[%s2701_s7 + $0x20] sm:$0xff] (!%p1758_p8)  ;;  %v1489_v10 = vld [vmem:[%s2701_s7 + $0x28] sm:$0xff] (!%p1758_p8) }
 0x4d6   : > { %v1503_v11 = vadd.f32 (!%p1758_p8), %v2428_v35, %v1487_v8  ;;  %v1504_v34 = vadd.f32 (!%p1758_p8), %v1488_v9, %v2434_v38  ;;  %v1505_v36 = vadd.f32 (!%p1758_p8), %v1489_v10, %v2438_v40  ;;  %v1490_v33 = vld [vmem:[%s2701_s7 + $0x30] sm:$0xff] (!%p1758_p8)  ;;  %v1491_v12 = vld [vmem:[%s2701_s7 + $0x38] sm:$0xff] (!%p1758_p8)  ;;  %v1492_v13 = vld [vmem:[%s2701_s7 + $0x40] sm:$0xff] (!%p1758_p8) }
 0x4d7   : > { %1516 = vst [vmem:[%s2701_s7] sm:$0xff] (!%p1758_p8), %v1500_v5  ;;  %1517 = vst [vmem:[%s2701_s7 + $0x8] sm:$0xff] (!%p1758_p8), %v1501_v6  ;;  %v1506_v35 = vadd.f32 (!%p1758_p8), %v2432_v37, %v1490_v33  ;;  %v1507_v38 = vadd.f32 (!%p1758_p8), %v2436_v39, %v1491_v12  ;;  %v1508_v40 = vadd.f32 (!%p1758_p8), %v1492_v13, %v2442_v42  ;;  %v1493_v14 = vld [vmem:[%s2701_s7 + $0x48] sm:$0xff] (!%p1758_p8)  ;;  %v1494_v15 = vld [vmem:[%s2701_s7 + $0x50] sm:$0xff] (!%p1758_p8) }
 0x4d8   : > { %1518 = vst [vmem:[%s2701_s7 + $0x10] sm:$0xff] (!%p1758_p8), %v1502_v7  ;;  %v1495_v16 = vld [vmem:[%s2701_s7 + $0x58] sm:$0xff] (!%p1758_p8)  ;;  %1519 = vst [vmem:[%s2701_s7 + $0x18] sm:$0xff] (!%p1758_p8), %v1503_v11  ;;  %v1509_v37 = vadd.f32 (!%p1758_p8), %v1493_v14, %v2446_v44  ;;  %v1510_v39 = vadd.f32 (!%p1758_p8), %v2440_v41, %v1494_v15  ;;  %v1496_v17 = vld [vmem:[%s2701_s7 + $0x60] sm:$0xff] (!%p1758_p8) }
 0x4d9   : > { %1520 = vst [vmem:[%s2701_s7 + $0x20] sm:$0xff] (!%p1758_p8), %v1504_v34  ;;  %1521 = vst [vmem:[%s2701_s7 + $0x28] sm:$0xff] (!%p1758_p8), %v1505_v36  ;;  %v1511_v42 = vadd.f32 (!%p1758_p8), %v2444_v43, %v1495_v16  ;;  %v1497_v18 = vld [vmem:[%s2701_s7 + $0x68] sm:$0xff] (!%p1758_p8)  ;;  %v1498_v19 = vld [vmem:[%s2701_s7 + $0x70] sm:$0xff] (!%p1758_p8)  ;;  %v1512_v41 = vadd.f32 (!%p1758_p8), %v1496_v17, %v2450_v46 }
 0x4da   : > { %1522 = vst [vmem:[%s2701_s7 + $0x30] sm:$0xff] (!%p1758_p8), %v1506_v35  ;;  %1523 = vst [vmem:[%s2701_s7 + $0x38] sm:$0xff] (!%p1758_p8), %v1507_v38  ;;  %v1513_v43 = vadd.f32 (!%p1758_p8), %v1497_v18, %v2454_v48  ;;  %v1514_v44 = vadd.f32 (!%p1758_p8), %v2448_v45, %v1498_v19  ;;  %v1499_v20 = vld [vmem:[%s2701_s7 + $0x78] sm:$0xff] (!%p1758_p8) }
 0x4db   : > { %1524 = vst [vmem:[%s2701_s7 + $0x40] sm:$0xff] (!%p1758_p8), %v1508_v40  ;;  %1525 = vst [vmem:[%s2701_s7 + $0x48] sm:$0xff] (!%p1758_p8), %v1509_v37  ;;  %v1515_v46 = vadd.f32 (!%p1758_p8), %v2452_v47, %v1499_v20 }
 0x4dc   : > { %1526 = vst [vmem:[%s2701_s7 + $0x50] sm:$0xff] %v1510_v39  ;;  %1527 = vst [vmem:[%s2701_s7 + $0x58] sm:$0xff] %v1511_v42 }
 0x4dd   : > { %1528 = vst [vmem:[%s2701_s7 + $0x60] sm:$0xff] %v1512_v41  ;;  %1529 = vst [vmem:[%s2701_s7 + $0x68] sm:$0xff] %v1513_v43 }
 0x4de   : > { %1530 = vst [vmem:[%s2701_s7 + $0x70] sm:$0xff] %v1514_v44  ;;  %1531 = vst [vmem:[%s2701_s7 + $0x78] sm:$0xff] %v1515_v46 }
 0x4df PF: > { %s18_s26 = sadd.s32 1, %s2202_s26   ;;  %s2702_s24 = smov %s2198_s25 }
 0x4e0   : > { %p15_p9 = scmp.ge.s32.totalorder %s18_s26, 5   ;;  %s2703_s25 = smov %s2705_s27 }
 0x4e2   :  { %17 = sbr.rel (!%p15_p9) target bundleno = 2 (0x2), region = 109 }

</bundles_post_ra>
